<compile_context>
chip_gen: v6e
topology: v6e:2x2x1
jax: 0.10.0
libtpu: 0.0.40
codegen_flags: <defaults>
</compile_context>

<pallas_src>
import functools

import jax
import jax.numpy as jnp
from jax.experimental import pallas as pl
from jax.experimental.pallas import tpu as pltpu


def _dropout_kernel(x_ref, bits_ref, o_ref, *, thresh, scale, dropout_spikes):
    """Apply the dropout mask (derived from uint32 bits) to one tile."""
    keep = bits_ref[...] >= jnp.uint32(thresh)  # P(keep) = 1 - p
    if dropout_spikes:
        # mul(mask, x) == mask * x.bool(): output is scale where kept & x != 0.
        live = keep & (x_ref[...] != 0)
        o_ref[...] = jnp.where(
            live, jnp.float32(scale), jnp.float32(0.0)
        ).astype(o_ref.dtype)
    else:
        # x.mul(mask): kept elements are x / (1 - p), dropped are 0.
        o_ref[...] = jnp.where(
            keep,
            x_ref[...].astype(jnp.float32) * jnp.float32(scale),
            jnp.float32(0.0),
        ).astype(o_ref.dtype)


def td_dropout2_forward(x, key, p=0.5, dropout_spikes=False, training=True):
    """Forward pass of td_Dropout2.

    x:   [N, C, H, W] float array.
    key: jax PRNG key; determines the (cached) dropout mask, mirroring
         td_Dropout2.create_mask / self.mask.
    Returns an array with the same shape and dtype as x.
    """
    assert 0.0 <= p <= 1.0
    if not training or p == 0.0:
        return x
    if p >= 1.0:
        return jnp.zeros_like(x)

    orig_shape = x.shape
    total = x.size

    # Lane-dense 2D view: prefer a wide last dim (1024) so stores are unmasked.
    lane = 1024 if total % 1024 == 0 else 128
    assert total % lane == 0, "example sizes chosen so N*C*H*W is a multiple of 128"
    rows = total // lane
    x2d = x.reshape(rows, lane)

    # Random bits stand in for the module's cached mask (deterministic per key).
    bits2d = jax.random.bits(key, (rows, lane), dtype=jnp.uint32)

    # Integer threshold: keep iff bits >= p * 2^32  (uses all 32 bits).
    thresh = min(int(round(p * (1 << 32))), (1 << 32) - 1)
    scale = 1.0 / (1.0 - p)

    # ~2 MiB blocks: small enough for every chip's default scoped VMEM
    # (v5e 16 MiB, v6e/v7x 32 MiB) with 3 arrays x double-buffering, big enough
    # to amortize the ~0.35 us per-grid-step overhead (>=85% of HBM roofline).
    itemsize = max(jnp.dtype(x.dtype).itemsize, 4)
    target_rows = max(8, (2 * 1024 * 1024) // (lane * itemsize))
    if rows <= target_rows:
        br = rows                      # full extent -> (8,128) rule satisfied
    else:
        br = (target_rows // 8) * 8    # multiple of 8 sublanes
    grid = (pl.cdiv(rows, br),)

    kernel = functools.partial(
        _dropout_kernel,
        thresh=thresh,
        scale=float(scale),
        dropout_spikes=bool(dropout_spikes),
    )

    out2d = pl.pallas_call(
        kernel,
        out_shape=jax.ShapeDtypeStruct((rows, lane), x.dtype),
        grid=grid,
        in_specs=[
            pl.BlockSpec((br, lane), lambda i: (i, 0)),
            pl.BlockSpec((br, lane), lambda i: (i, 0)),
        ],
        out_specs=pl.BlockSpec((br, lane), lambda i: (i, 0)),
        compiler_params=pltpu.CompilerParams(
            dimension_semantics=("parallel",)),  # 2x on v7x dual TensorCores
    )(x2d, bits2d)

    return out2d.reshape(orig_shape)


if __name__ == "__main__":
    root = jax.random.PRNGKey(0)
    data_key, mask_key, spike_key = jax.random.split(root, 3)

    # small NCHW input consistent with a conv-style feature map
    x = jax.random.normal(data_key, (2, 4, 16, 16), dtype=jnp.float32)
    p = 0.5

    # --- dropout_spikes=False path: out = x * mask ---
    out = td_dropout2_forward(x, mask_key, p=p, dropout_spikes=False, training=True)
    out = jax.block_until_ready(out)

    assert out.shape == x.shape and out.dtype == x.dtype
    expected_scale = 1.0 / (1.0 - p)
    ratio = jnp.where(out != 0, out / x, 0.0)
    assert bool(jnp.all(
        jnp.abs(jnp.where(out != 0, ratio - expected_scale, 0.0)) < 1e-5))
    drop_frac = float(jnp.mean((out == 0).astype(jnp.float32)))
    assert 0.3 < drop_frac < 0.7  # ~p of elements dropped

    # eval mode is identity
    out_eval = td_dropout2_forward(x, mask_key, p=p, training=False)
    assert bool(jnp.all(out_eval == x))

    # --- dropout_spikes=True path: out = mask * bool(x) ---
    spikes = (jax.random.uniform(spike_key, x.shape) < 0.3).astype(jnp.float32)
    out_s = td_dropout2_forward(spikes, mask_key, p=p, dropout_spikes=True,
                                training=True)
    out_s = jax.block_until_ready(out_s)
    # values must be exactly 0 or 1/(1-p), and nonzero only where spike fired
    vals_ok = jnp.logical_or(out_s == 0.0,
                             jnp.abs(out_s - expected_scale) < 1e-5)
    assert bool(jnp.all(vals_ok))
    assert bool(jnp.all(jnp.where(spikes == 0.0, out_s == 0.0, True)))

    print("KERNEL_OK")
</pallas_src>

<mosaic_0001>
module attributes {stable_mosaic.version = 11 : i64} {
  func.func @_dropout_kernel(%arg0: i32, %arg1: memref<2x1024xf32, #tpu.memory_space<vmem>>, %arg2: memref<2x1024xi32, #tpu.memory_space<vmem>>, %arg3: memref<2x1024xf32, #tpu.memory_space<vmem>>) attributes {dimension_semantics = [#tpu.dimension_semantics<parallel>], iteration_bounds = array<i64: 1>, scalar_prefetch = 0 : i64, scratch_operands = 0 : i64, tpu.core_type = #tpu.core_type<tc>, window_params = [{transform_indices = @transform_0, window_bounds = array<i64: 2, 1024>}, {transform_indices = @transform_1, window_bounds = array<i64: 2, 1024>}, {transform_indices = @transform_2, window_bounds = array<i64: 2, 1024>}]} {
    %c0 = arith.constant 0 : index
    %c0_0 = arith.constant 0 : index
    %0 = vector.load %arg2[%c0, %c0_0] : memref<2x1024xi32, #tpu.memory_space<vmem>>, vector<2x1024xi32>
    %c-2147483648_i32 = arith.constant -2147483648 : i32
    %1 = vector.broadcast %c-2147483648_i32 : i32 to vector<2x1024xi32>
    %2 = arith.cmpi uge, %0, %1 : vector<2x1024xi32>
    %c0_1 = arith.constant 0 : index
    %c0_2 = arith.constant 0 : index
    %3 = vector.load %arg1[%c0_1, %c0_2] : memref<2x1024xf32, #tpu.memory_space<vmem>>, vector<2x1024xf32>
    %cst = arith.constant 2.000000e+00 : f32
    %4 = vector.broadcast %cst : f32 to vector<2x1024xf32>
    %5 = arith.mulf %3, %4 : vector<2x1024xf32>
    %cst_3 = arith.constant 0.000000e+00 : f32
    %6 = vector.broadcast %cst_3 : f32 to vector<2x1024xf32>
    %7 = arith.select %2, %5, %6 : vector<2x1024xi1>, vector<2x1024xf32>
    %c0_4 = arith.constant 0 : index
    %c0_5 = arith.constant 0 : index
    %8 = vector.load %arg3[%c0_4, %c0_5] : memref<2x1024xf32, #tpu.memory_space<vmem>>, vector<2x1024xf32>
    tpu.vector_store %arg3[%c0_4, %c0_5], %7 {strides = array<i32>} : memref<2x1024xf32, #tpu.memory_space<vmem>>, vector<2x1024xf32>,
    return
  }
  func.func @transform_0(%arg0: i32) -> (i32, i32) {
    %c0_i32 = arith.constant 0 : i32
    %c0_i32_0 = arith.constant 0 : i32
    return %arg0, %c0_i32 : i32, i32
  }
  func.func @transform_1(%arg0: i32) -> (i32, i32) {
    %c0_i32 = arith.constant 0 : i32
    %c0_i32_0 = arith.constant 0 : i32
    return %arg0, %c0_i32 : i32, i32
  }
  func.func @transform_2(%arg0: i32) -> (i32, i32) {
    %c0_i32 = arith.constant 0 : i32
    %c0_i32_0 = arith.constant 0 : i32
    return %arg0, %c0_i32 : i32, i32
  }
}

</mosaic_0001>

<bundles_post_ra>
// kernel: tpu_custom_call.1
= control target key start
LH: loop header
LB: loop body
LE: loop exit
PB: predicated region body
PF: predicated region fallthrough
CT: control target
= control target key end

     0   :  { %7 = vsyncpa [#allocation3], 0  ;;  %s160_s0 = inlined_call_operand.hbm [shape: f32[2,1024], index: 0, kind: input, shape index: {}]   ;;  %s161_s1 = inlined_call_operand.hbm [shape: u32[2,1024], index: 1, kind: input, shape index: {}]   ;;  %s162_s2 = inlined_call_operand.hbm [shape: f32[2,1024], index: 2, kind: output, shape index: {}]  }
   0x1   :  { %8 = vsyncpa [#allocation6], 0 }
   0x2   :  { %9 = vsyncpa [#allocation4], 0  ;;  %s133_s9 = smov [#allocation2]   ;;  %s134_s11 = smov [#allocation5]  }
   0x3   :  { %s16_s10 = sshll.u32 %s133_s9, 4  ;;  %s26_s12 = sshll.u32 %s134_s11, 4  ;;  %s17_s10 = int_to_ptr.vmem [resolvable:$true] %s16_s10  ;;  %s27_s12 = int_to_ptr.vmem [resolvable:$true] %s26_s12 }
   0x4   :  { %s75_s13 = scalar_lea.vmem %s17_s10, 256  ;;  %p80_p1 = scmp.lt.s32.totalorder %s17_s10, %s17_s10 }
   0x5   :  { %p76_p0 = scmp.ne.s32.totalorder %s17_s10, %s75_s13  ;;  %p81_p2 = scmp.lt.s32.totalorder %s75_s13, %s75_s13 }
   0x7   :  { %p82_p3 = por %p81_p2, %p80_p1 }
   0x9   :  { %p83_p4 = pnand %p82_p3, %p76_p0 }
   0xb   :  { %86 = shalt.err (!%p83_p4)
}
   0xc   :  { %19 = dma.hbm_to_vmem [thread:$0]  %s160_s0, 256, %s17_s10, [#allocation3]  }
   0xd   :  { %s95_s16 = scalar_lea.vmem %s27_s12, 256  ;;  %p100_p6 = scmp.lt.s32.totalorder %s27_s12, %s27_s12 }
   0xe   :  { %p96_p5 = scmp.ne.s32.totalorder %s27_s12, %s95_s16  ;;  %p101_p7 = scmp.lt.s32.totalorder %s95_s16, %s95_s16 }
  0x10   :  { %p102_p8 = por %p101_p7, %p100_p6 }
  0x12   :  { %p103_p9 = pnand %p102_p8, %p96_p5 }
  0x14   :  { %106 = shalt.err (!%p103_p9)
}
  0x15   :  { %29 = dma.hbm_to_vmem [thread:$0]  %s161_s1, 256, %s27_s12, [#allocation6]  }
  0x16   :  { %127 = dma.done.wait [#allocation3], 256  }
  0x17   :  { %128 = vsyncadd [#allocation3], 4294967040 }
  0x18   :  { %129 = dma.done.wait [#allocation6], 256  }
  0x19   :  { %130 = vsyncadd [#allocation6], 4294967040  ;;  %v36_v0 = vld [vmem:[#allocation5] sm:$0xff]  ;;  %v40_v1 = vld [vmem:[#allocation2] sm:$0xff]  ;;  %s135_s19 = smov [#allocation7]  }
  0x1a   :  { %v37_v2 = vld [vmem:[#allocation5 + $0x8] sm:$0xff]  ;;  %s54_s0 = sshll.u32 %s135_s19, 4  ;;  %vm38_vm0 = vcmp.ge.u32.totalorder %v36_v0, 2147483648  ;;  %v42_v3 = vmul.f32 2.0, %v40_v1  ;;  %v41_v4 = vld [vmem:[#allocation2 + $0x8] sm:$0xff]  ;;  %s55_s0 = int_to_ptr.vmem [resolvable:$true] %s54_s0 }
  0x1b   :  { %vm39_vm1 = vcmp.ge.u32.totalorder %v37_v2, 2147483648  ;;  %v43_v5 = vmul.f32 2.0, %v41_v4  ;;  %s107_s1 = scalar_lea.vmem %s55_s0, 256  ;;  %p112_p11 = scmp.lt.s32.totalorder %s55_s0, %s55_s0 }
  0x1c   :  { %v44_v6 = vsel %vm38_vm0, %v42_v3, 0.0  ;;  %p108_p10 = scmp.ne.s32.totalorder %s55_s0, %s107_s1  ;;  %p113_p12 = scmp.lt.s32.totalorder %s107_s1, %s107_s1 }
  0x1d   :  { %46 = vst [vmem:[#allocation7] sm:$0xff] %v44_v6  ;;  %v45_v7 = vsel %vm39_vm1, %v43_v5, 0.0 }
  0x1e   :  { %47 = vst [vmem:[#allocation7 + $0x8] sm:$0xff] %v45_v7  ;;  %p114_p13 = por %p113_p12, %p112_p11 }
  0x20   :  { %p115_p0 = pnand %p114_p13, %p108_p10 }
  0x22   :  { %118 = shalt.err (!%p115_p0)
}
  0x23   :  { %57 = dma.vmem_to_hbm [thread:$0]  %s55_s0, 256, %s162_s2, [#allocation4]  }
  0x24   :  { %131 = dma.done.wait [#allocation4], 256  }
  0x25   :  { %132 = vsyncadd [#allocation4], 4294967040 }
  0x26   :  { %61 = vsyncpa [#allocation3], 1 }
  0x27   :  { %62 = vsyncpa [#allocation6], 1 }
  0x28   :  { %63 = vsyncpa [#allocation4], 1 }

</bundles_post_ra>
